<compile_context>
chip_gen: v5e
topology: v5e:2x2
jax: 0.10.0
libtpu: 0.0.40
codegen_flags: <defaults>
</compile_context>

<pallas_src>
import functools
import math

import jax
import jax.numpy as jnp
from jax.experimental import pallas as pl
from jax.experimental.pallas import tpu as pltpu


def _cdropout_kernel(xr_ref, xi_ref, seed_ref, or_ref, oi_ref, *,
                     p, row_tile, lanes):
    """xr/xi/or/oi: (row_tile, lanes) f32 tiles.  seed_ref: (1,) int32 (SMEM)."""
    # Global complex-element index of every position in this tile.
    rows = jax.lax.broadcasted_iota(jnp.int32, (row_tile, lanes), 0)
    cols = jax.lax.broadcasted_iota(jnp.int32, (row_tile, lanes), 1)
    idx = (pl.program_id(0) * row_tile + rows) * lanes + cols

    # Counter-based PRNG: murmur3 fmix32 of (index ^ seed * golden-ratio).
    # Deterministic per (seed, element); independent of tiling / grid order /
    # which TensorCore runs the tile.
    h = idx.astype(jnp.uint32) ^ (seed_ref[0].astype(jnp.uint32) *
                                  jnp.uint32(0x9E3779B9))
    h = h ^ (h >> 16)
    h = h * jnp.uint32(0x85EBCA6B)
    h = h ^ (h >> 13)
    h = h * jnp.uint32(0xC2B2AE35)
    h = h ^ (h >> 16)

    # Drop with probability p: drop iff h < round(p * 2^32).  (p is quantized
    # to 32 bits and the threshold is capped at 2^32-1; negligible for sane p.)
    thresh = min(int(round(p * 4294967296.0)), 4294967295)
    keep = h >= jnp.uint32(thresh)
    scale = jnp.where(keep, jnp.float32(1.0 / (1.0 - p)), jnp.float32(0.0))

    # Same mask applied to real and imaginary planes (complex dropout).
    or_ref[...] = xr_ref[...] * scale
    oi_ref[...] = xi_ref[...] * scale


def _choose_lanes(total):
    """Lane width L for the flattened (R, L) view.

    Prefer a large multiple of 128 that divides `total` exactly (no padding,
    unmasked lane-dense stores); fall back to one full row for small odd
    sizes, or to padding the flat tail (< L elements, rare) otherwise.
    Returns (lanes, pad_elements)."""
    for want_rows in (8, 1):
        for lanes in (2048, 1024, 512, 256, 128):
            if total % lanes == 0 and total // lanes >= want_rows:
                return lanes, 0
    if total <= 64 * 1024:
        return total, 0            # single full-extent block; still correct
    lanes = 512
    return lanes, (-total) % lanes


def _choose_row_tile(n_rows, lanes):
    """Sublane-aligned row tile.

    Budget ~12 MiB of VMEM for the 8 double-buffered f32 tiles (2 planes x
    in/out x 2 buffers) plus ~3 tile-sized intermediates (iota/hash/mask) --
    safe under v5e's 16 MiB scoped default and v7x's 64 MiB physical VMEM --
    and cap the tile so the grid has >= ~4 steps when possible so the
    "parallel" axis can shard across both v7x TensorCores."""
    budget = 12 * 1024 * 1024
    per_row = (8 + 3) * lanes * 4
    tile = max(8, budget // per_row)
    if n_rows >= 32:
        quarter = -(-n_rows // 4)                 # ceil(n_rows / 4)
        tile = min(tile, -(-quarter // 8) * 8)    # rounded up to sublanes
    tile = min(tile, n_rows)
    if tile < 8:
        return n_rows                             # tiny array: one full block
    return (tile // 8) * 8


@functools.partial(jax.jit, static_argnames=("p",))
def _cdropout_train(x, seed, *, p):
    shape = x.shape
    total = math.prod(shape)

    # Split into real/imag planes (fuses to one HBM pass under jit) and
    # flatten to a lane-dense (R, L) view decoupled from the trailing dims.
    xr = jnp.real(x).astype(jnp.float32).reshape(-1)
    xi = jnp.imag(x).astype(jnp.float32).reshape(-1)

    lanes, pad = _choose_lanes(total)
    if pad:
        # Rare fallback (no multiple-of-128 divisor): pad only the flat tail.
        xr = jnp.pad(xr, (0, pad))
        xi = jnp.pad(xi, (0, pad))
    n_rows = (total + pad) // lanes
    xr2 = xr.reshape(n_rows, lanes)
    xi2 = xi.reshape(n_rows, lanes)

    row_tile = _choose_row_tile(n_rows, lanes)
    grid = (pl.cdiv(n_rows, row_tile),)   # partial last block masked by Pallas

    kernel = functools.partial(_cdropout_kernel, p=p, row_tile=row_tile,
                               lanes=lanes)
    seed_arr = jnp.asarray(seed, dtype=jnp.int32).reshape((1,))
    data_spec = pl.BlockSpec((row_tile, lanes), lambda i: (i, 0))

    out_r2, out_i2 = pl.pallas_call(
        kernel,
        grid=grid,
        in_specs=[data_spec, data_spec,
                  pl.BlockSpec(memory_space=pltpu.MemorySpace.SMEM)],
        out_specs=[data_spec, data_spec],
        out_shape=[jax.ShapeDtypeStruct((n_rows, lanes), jnp.float32),
                   jax.ShapeDtypeStruct((n_rows, lanes), jnp.float32)],
        # Donate the temporary planes: in-place HBM, halves peak footprint.
        input_output_aliases={0: 0, 1: 1},
        compiler_params=pltpu.CompilerParams(
            dimension_semantics=("parallel",),
            vmem_limit_bytes=32 * 1024 * 1024),
    )(xr2, xi2, seed_arr)

    if pad:
        out_r = out_r2.reshape(-1)[:total].reshape(shape)
        out_i = out_i2.reshape(-1)[:total].reshape(shape)
    else:
        out_r = out_r2.reshape(shape)
        out_i = out_i2.reshape(shape)
    out = jax.lax.complex(out_r, out_i)
    return out if out.dtype == x.dtype else out.astype(x.dtype)


def cdropout(x, p=0.5, *, seed=0, training=True):
    """Forward pass of cDropout (shared real/imag mask, inverted scaling)."""
    if not training or p == 0.0:
        return x
    x = jnp.asarray(x)
    if p >= 1.0:
        return jnp.zeros_like(x)
    p = float(p)
    seed_arr = jnp.asarray(seed, dtype=jnp.int32)
    if not jnp.issubdtype(x.dtype, jnp.complexfloating):
        # complexDropout on a real tensor just multiplies by the real mask.
        xc = jax.lax.complex(x.astype(jnp.float32),
                             jnp.zeros(x.shape, jnp.float32))
        return jnp.real(_cdropout_train(xc, seed_arr, p=p)).astype(x.dtype)
    return _cdropout_train(x, seed_arr, p=p)


if __name__ == "__main__":
    key = jax.random.PRNGKey(0)
    k1, k2 = jax.random.split(key)

    N, C, H, W = 2, 4, 16, 16
    p = 0.5

    x_real = jax.random.normal(k1, (N, C, H, W), dtype=jnp.float32)
    x_imag = jax.random.normal(k2, (N, C, H, W), dtype=jnp.float32)
    x = jax.lax.complex(x_real, x_imag)

    out = cdropout(x, p=p, seed=0, training=True)
    jax.block_until_ready(out)

    # Sanity checks.
    scale = 1.0 / (1.0 - p)
    out_r, out_i = jnp.real(out), jnp.imag(out)
    kept = (jnp.abs(out_r) + jnp.abs(out_i)) > 0          # shared keep mask
    expected = jnp.where(kept, x * scale, jnp.zeros_like(x))
    assert bool(jnp.allclose(out, expected, atol=1e-5, rtol=1e-5)), \
        "kept elements must equal x/(1-p), dropped must be exactly 0"
    frac_dropped = 1.0 - float(jnp.mean(kept.astype(jnp.float32)))
    assert 0.3 < frac_dropped < 0.7, frac_dropped

    # Different seeds -> different masks.
    out_seed1 = cdropout(x, p=p, seed=1, training=True)
    assert not bool(jnp.allclose(out_seed1, out))

    # Eval mode is the identity (module semantics).
    out_eval = cdropout(x, p=p, seed=0, training=False)
    assert bool(jnp.allclose(out_eval, x))

    print("KERNEL_OK")
</pallas_src>

<mosaic_0001>
module attributes {stable_mosaic.version = 11 : i64} {
  func.func @_cdropout_kernel(%arg0: i32, %arg1: memref<8x256xf32, #tpu.memory_space<vmem>>, %arg2: memref<8x256xf32, #tpu.memory_space<vmem>>, %arg3: memref<1xi32, #tpu.memory_space<smem>>, %arg4: memref<8x256xf32, #tpu.memory_space<vmem>>, %arg5: memref<8x256xf32, #tpu.memory_space<vmem>>) attributes {dimension_semantics = [#tpu.dimension_semantics<parallel>], iteration_bounds = array<i64: 1>, scalar_prefetch = 0 : i64, scratch_operands = 0 : i64, tpu.core_type = #tpu.core_type<tc>, window_params = [{transform_indices = @transform_0, window_bounds = array<i64: 8, 256>}, {transform_indices = @transform_1, window_bounds = array<i64: 8, 256>}, {transform_indices = @transform_2, window_bounds = array<i64: 1>}, {transform_indices = @transform_3, window_bounds = array<i64: 8, 256>}, {transform_indices = @transform_4, window_bounds = array<i64: 8, 256>}]} {
    %0 = tpu.iota {dimensions = array<i32: 0>} : vector<8x256xi32>
    %1 = tpu.iota {dimensions = array<i32: 1>} : vector<8x256xi32>
    %c8_i32 = arith.constant 8 : i32
    %2 = arith.muli %arg0, %c8_i32 : i32
    %3 = vector.broadcast %2 : i32 to vector<8x256xi32>
    %4 = arith.addi %3, %0 : vector<8x256xi32>
    %c256_i32 = arith.constant 256 : i32
    %5 = vector.broadcast %c256_i32 : i32 to vector<8x256xi32>
    %6 = arith.muli %4, %5 : vector<8x256xi32>
    %7 = arith.addi %6, %1 : vector<8x256xi32>
    %c0 = arith.constant 0 : index
    %8 = memref.load %arg3[%c0] : memref<1xi32, #tpu.memory_space<smem>>
    %c-1640531527_i32 = arith.constant -1640531527 : i32
    %9 = arith.muli %8, %c-1640531527_i32 : i32
    %10 = vector.broadcast %9 : i32 to vector<8x256xi32>
    %11 = arith.xori %7, %10 : vector<8x256xi32>
    %c16_i32 = arith.constant 16 : i32
    %12 = vector.broadcast %c16_i32 : i32 to vector<8x256xi32>
    %13 = arith.shrui %11, %12 : vector<8x256xi32>
    %14 = arith.xori %11, %13 : vector<8x256xi32>
    %c-2048144789_i32 = arith.constant -2048144789 : i32
    %15 = vector.broadcast %c-2048144789_i32 : i32 to vector<8x256xi32>
    %16 = arith.muli %14, %15 : vector<8x256xi32>
    %c13_i32 = arith.constant 13 : i32
    %17 = vector.broadcast %c13_i32 : i32 to vector<8x256xi32>
    %18 = arith.shrui %16, %17 : vector<8x256xi32>
    %19 = arith.xori %16, %18 : vector<8x256xi32>
    %c-1028477387_i32 = arith.constant -1028477387 : i32
    %20 = vector.broadcast %c-1028477387_i32 : i32 to vector<8x256xi32>
    %21 = arith.muli %19, %20 : vector<8x256xi32>
    %c16_i32_0 = arith.constant 16 : i32
    %22 = vector.broadcast %c16_i32_0 : i32 to vector<8x256xi32>
    %23 = arith.shrui %21, %22 : vector<8x256xi32>
    %24 = arith.xori %21, %23 : vector<8x256xi32>
    %c-2147483648_i32 = arith.constant -2147483648 : i32
    %25 = vector.broadcast %c-2147483648_i32 : i32 to vector<8x256xi32>
    %26 = arith.cmpi uge, %24, %25 : vector<8x256xi32>
    %cst = arith.constant 2.000000e+00 : f32
    %cst_1 = arith.constant 0.000000e+00 : f32
    %27 = vector.broadcast %cst : f32 to vector<8x256xf32>
    %28 = vector.broadcast %cst_1 : f32 to vector<8x256xf32>
    %29 = arith.select %26, %27, %28 : vector<8x256xi1>, vector<8x256xf32>
    %c0_2 = arith.constant 0 : index
    %c0_3 = arith.constant 0 : index
    %30 = vector.load %arg1[%c0_2, %c0_3] : memref<8x256xf32, #tpu.memory_space<vmem>>, vector<8x256xf32>
    %31 = arith.mulf %30, %29 : vector<8x256xf32>
    %c0_4 = arith.constant 0 : index
    %c0_5 = arith.constant 0 : index
    %32 = vector.load %arg4[%c0_4, %c0_5] : memref<8x256xf32, #tpu.memory_space<vmem>>, vector<8x256xf32>
    tpu.vector_store %arg4[%c0_4, %c0_5], %31 {strides = array<i32>} : memref<8x256xf32, #tpu.memory_space<vmem>>, vector<8x256xf32>,
    %c0_6 = arith.constant 0 : index
    %c0_7 = arith.constant 0 : index
    %33 = vector.load %arg2[%c0_6, %c0_7] : memref<8x256xf32, #tpu.memory_space<vmem>>, vector<8x256xf32>
    %34 = arith.mulf %33, %29 : vector<8x256xf32>
    %c0_8 = arith.constant 0 : index
    %c0_9 = arith.constant 0 : index
    %35 = vector.load %arg5[%c0_8, %c0_9] : memref<8x256xf32, #tpu.memory_space<vmem>>, vector<8x256xf32>
    tpu.vector_store %arg5[%c0_8, %c0_9], %34 {strides = array<i32>} : memref<8x256xf32, #tpu.memory_space<vmem>>, vector<8x256xf32>,
    return
  }
  func.func @transform_0(%arg0: i32) -> (i32, i32) {
    %c0_i32 = arith.constant 0 : i32
    %c0_i32_0 = arith.constant 0 : i32
    return %arg0, %c0_i32 : i32, i32
  }
  func.func @transform_1(%arg0: i32) -> (i32, i32) {
    %c0_i32 = arith.constant 0 : i32
    %c0_i32_0 = arith.constant 0 : i32
    return %arg0, %c0_i32 : i32, i32
  }
  func.func @transform_2(%arg0: i32) -> i32 {
    %c0_i32 = arith.constant 0 : i32
    %c0_i32_0 = arith.constant 0 : i32
    return %c0_i32 : i32
  }
  func.func @transform_3(%arg0: i32) -> (i32, i32) {
    %c0_i32 = arith.constant 0 : i32
    %c0_i32_0 = arith.constant 0 : i32
    return %arg0, %c0_i32 : i32, i32
  }
  func.func @transform_4(%arg0: i32) -> (i32, i32) {
    %c0_i32 = arith.constant 0 : i32
    %c0_i32_0 = arith.constant 0 : i32
    return %arg0, %c0_i32 : i32, i32
  }
}

</mosaic_0001>

<bundles_post_ra>
// kernel: custom-call.1
= control target key start
LH: loop header
LB: loop body
LE: loop exit
PB: predicated region body
PF: predicated region fallthrough
CT: control target
= control target key end

     0   :  { %s56_s0 = inlined_call_operand.hbm [shape: c64[2,4,16,16], index: 0, kind: input, shape index: {}]   ;;  %s57_s1 = inlined_call_operand.vmem [shape: f32[2,4,16,16], index: 1, kind: output, shape index: {}]  }
   0x1   :  { %s2_s8 = scalar_lea.hbm %s56_s0, 128 }
   0x2   :  { %3 = vsyncpa [#allocation0], 0  ;;  %s5_s9 = sshll.u32 %s2_s8, 4  ;;  %s7_s12 = sshll.u32 %s57_s1, 4  ;;  %s6_s9 = int_to_ptr.hbm [resolvable:$true] %s5_s9  ;;  %s8_s12 = int_to_ptr.vmem [resolvable:$true] %s7_s12 }
   0x3   :  { %10 = dma.hbm_to_vmem [thread:$0]  %s6_s9, 2048, %s8_s12, [#allocation0] }
   0x4   :  { %38 = dma.done.wait [#allocation0], 2048  }
   0x5   :  { %39 = vsyncadd [#allocation0], 4294965248 }
   0x6   :  { %13 = vsyncpa [#allocation0], 1 }

// kernel: custom-call
= control target key start
LH: loop header
LB: loop body
LE: loop exit
PB: predicated region body
PF: predicated region fallthrough
CT: control target
= control target key end

     0   :  { %2 = vsyncpa [#allocation0], 0  ;;  %s55_s0 = inlined_call_operand.hbm [shape: c64[2,4,16,16], index: 0, kind: input, shape index: {}]   ;;  %s56_s1 = inlined_call_operand.vmem [shape: f32[2,4,16,16], index: 1, kind: output, shape index: {}]  }
   0x1   :  { %s4_s8 = sshll.u32 %s55_s0, 4  ;;  %s6_s11 = sshll.u32 %s56_s1, 4  ;;  %s5_s8 = int_to_ptr.hbm [resolvable:$true] %s4_s8  ;;  %s7_s11 = int_to_ptr.vmem [resolvable:$true] %s6_s11 }
   0x2   :  { %9 = dma.hbm_to_vmem [thread:$0]  %s5_s8, 2048, %s7_s11, [#allocation0] }
   0x3   :  { %37 = dma.done.wait [#allocation0], 2048  }
   0x4   :  { %38 = vsyncadd [#allocation0], 4294965248 }
   0x5   :  { %12 = vsyncpa [#allocation0], 1 }

// kernel: custom-call.2
= control target key start
LH: loop header
LB: loop body
LE: loop exit
PB: predicated region body
PF: predicated region fallthrough
CT: control target
= control target key end

     0   :  { %s105_s0 = inlined_call_operand.vmem [shape: f32[2,4,16,16], index: 0, kind: input, shape index: {}]   ;;  %s106_s1 = inlined_call_operand.vmem [shape: f32[2,4,16,16], index: 1, kind: input, shape index: {}]   ;;  %s107_s2 = inlined_call_operand.hbm [shape: c64[2,4,16,16], index: 2, kind: output, shape index: {}]  }
   0x1   :  { %s3_s11 = scalar_lea.hbm %s107_s2, 128 }
   0x2   :  { %4 = vsyncpa [#allocation0], 0  ;;  %s6_s14 = sshll.u32 %s105_s0, 4  ;;  %s8_s17 = sshll.u32 %s107_s2, 4  ;;  %s7_s14 = int_to_ptr.vmem [resolvable:$true] %s6_s14  ;;  %s9_s17 = int_to_ptr.hbm [resolvable:$true] %s8_s17 }
   0x3   :  { %11 = dma.vmem_to_hbm [thread:$0]  %s7_s14, 2048, %s9_s17, [#allocation0] }
   0x4   :  { %74 = dma.done.wait [#allocation0], 2048  }
   0x5   :  { %75 = vsyncadd [#allocation0], 4294965248 }
   0x6   :  { %14 = vsyncpa [#allocation0], 1 }
   0x7   :  { %15 = vsyncpa [#allocation1], 0  ;;  %s17_s20 = sshll.u32 %s106_s1, 4  ;;  %s19_s21 = sshll.u32 %s3_s11, 4  ;;  %s18_s20 = int_to_ptr.vmem [resolvable:$true] %s17_s20  ;;  %s20_s21 = int_to_ptr.hbm [resolvable:$true] %s19_s21 }
   0x8   :  { %22 = dma.vmem_to_hbm [thread:$0]  %s18_s20, 2048, %s20_s21, [#allocation1] }
   0x9   :  { %76 = dma.done.wait [#allocation1], 2048  }
   0xa   :  { %77 = vsyncadd [#allocation1], 4294965248 }
   0xb   :  { %25 = vsyncpa [#allocation1], 1 }

// kernel: _cdropout_train.1
= control target key start
LH: loop header
LB: loop body
LE: loop exit
PB: predicated region body
PF: predicated region fallthrough
CT: control target
= control target key end

     0   :  { %v17_v0 = vlaneseq  ;;  %v80_v32 = vmov 0.0   ;;  %s133_s2 = inlined_call_operand.<no memory space> [shape: s32[1], index: 2, kind: input, shape index: {}]   ;;  %s134_s0 = inlined_call_operand.vmem [shape: f32[8,256], index: 0, kind: input, shape index: {}, may-alias: {0,3}]   ;;  %s135_s1 = inlined_call_operand.vmem [shape: f32[8,256], index: 1, kind: input, shape index: {}, may-alias: {1,4}]   ;;  %s136_s3 = inlined_call_operand.vmem [shape: f32[8,256], index: 3, kind: output, shape index: {0}, may-alias: {0,3}]   ;;  %s137_s4 = inlined_call_operand.vmem [shape: f32[8,256], index: 4, kind: output, shape index: {1}, may-alias: {1,4}]  }
   0x1   :  { %s29_s17 = smul.u32 2654435769, %s133_s2  ;;  %v57_v28 = vld [vmem:[%s134_s0] sm:$0xff]  ;;  %v58_v29 = vld [vmem:[%s134_s0 + $0x8] sm:$0xff] }
   0x2   :  { %v18_v1 = vshrl.u32 %v17_v0, 7  ;;  %v20_v2 = vand.u32 127, %v17_v0  ;;  %v63_v30 = vld [vmem:[%s135_s1] sm:$0xff]  ;;  %v64_v31 = vld [vmem:[%s135_s1 + $0x8] sm:$0xff] }
   0x3   :  { %v30_v5 = vstv %s29_s17 }
   0x4   :  { %v25_v3 = vmul.u32 256, %v18_v1  ;;  %v21_v4 = vadd.s32 128, %v20_v2 }
   0x6   :  { %v26_v6 = vadd.s32 %v25_v3, %v20_v2  ;;  %v27_v7 = vadd.s32 %v25_v3, %v21_v4 }
   0x8   :  { %v31_v8 = vxor.u32 %v30_v5, %v26_v6  ;;  %v32_v9 = vxor.u32 %v30_v5, %v27_v7 }
   0xa   :  { %v33_v10 = vshrl.u32 %v31_v8, 16  ;;  %v34_v11 = vshrl.u32 %v32_v9, 16 }
   0xc   :  { %v35_v12 = vxor.u32 %v33_v10, %v31_v8  ;;  %v36_v13 = vxor.u32 %v34_v11, %v32_v9 }
   0xe   :  { %v37_v14 = vmul.u32 2246822507, %v35_v12  ;;  %v38_v15 = vmul.u32 2246822507, %v36_v13 }
  0x10   :  { %v39_v16 = vshrl.u32 %v37_v14, 13  ;;  %v40_v17 = vshrl.u32 %v38_v15, 13 }
  0x12   :  { %v41_v18 = vxor.u32 %v39_v16, %v37_v14  ;;  %v42_v19 = vxor.u32 %v40_v17, %v38_v15 }
  0x14   :  { %v43_v20 = vmul.u32 3266489909, %v41_v18  ;;  %v44_v21 = vmul.u32 3266489909, %v42_v19 }
  0x16   :  { %v45_v22 = vshrl.u32 %v43_v20, 16  ;;  %v46_v23 = vshrl.u32 %v44_v21, 16 }
  0x18   :  { %v47_v24 = vxor.u32 %v45_v22, %v43_v20  ;;  %v48_v25 = vxor.u32 %v46_v23, %v44_v21 }
  0x1a   :  { %v77_v26 = vxor.u32 2147483648, %v47_v24  ;;  %v78_v27 = vxor.u32 2147483648, %v48_v25 }
  0x1c   :  { %vm51_vm0 = vcmp.ge.s32.totalorder %v77_v26, 0  ;;  %vm54_vm1 = vcmp.ge.s32.totalorder %v78_v27, 0 }
  0x1d   :  { %v55_v33 = vsel %vm51_vm0, 2.0, %v80_v32  ;;  %v56_v34 = vsel %vm54_vm1, 2.0, %v80_v32 }
  0x1e   :  { %v59_v35 = vmul.f32 %v57_v28, %v55_v33  ;;  %v60_v36 = vmul.f32 %v58_v29, %v56_v34  ;;  %v65_v37 = vmul.f32 %v63_v30, %v55_v33  ;;  %v66_v38 = vmul.f32 %v64_v31, %v56_v34 }
  0x20   :  { %61 = vst [vmem:[%s136_s3] sm:$0xff] %v59_v35 }
  0x21   :  { %62 = vst [vmem:[%s136_s3 + $0x8] sm:$0xff] %v60_v36 }
  0x22   :  { %67 = vst [vmem:[%s137_s4] sm:$0xff] %v65_v37 }
  0x23   :  { %68 = vst [vmem:[%s137_s4 + $0x8] sm:$0xff] %v66_v38 }

</bundles_post_ra>
